<compile_context>
chip_gen: v7x
topology: tpu7x:2x2x1
jax: 0.10.0
libtpu: 0.0.40
codegen_flags: <defaults>
</compile_context>

<pallas_src>
import functools

import jax
import jax.numpy as jnp
from jax.experimental import pallas as pl
from jax.experimental.pallas import tpu as pltpu


def _rmsnorm_kernel(x_ref, alpha_ref, o_ref, *, eps, approx_recip):
    # x_ref:     (block_rows, d_model) tile in VMEM (original dtype)
    # alpha_ref: (1, d_model) scale vector in the "scale dtype", VMEM-resident
    #
    # The f32 upcast is consumed immediately by the reduction (not reused for
    # the scale path), so no full-tile f32 copy stays live across the body.
    xf = x_ref[...].astype(jnp.float32)
    ms = jnp.mean(xf * xf, axis=-1, keepdims=True)            # (rows, 1) f32
    denom = jnp.sqrt(ms) + eps                                # eps AFTER sqrt (PyTorch ref)
    inv = pl.reciprocal(denom, approx=approx_recip)           # per-row; EUP when approx

    scale_dtype = alpha_ref.dtype                             # f32, or bf16 on v6e/v7x
    inv_s = inv.astype(scale_dtype)                           # (rows, 1) cheap cast
    o_ref[...] = (
        x_ref[...].astype(scale_dtype) * inv_s * alpha_ref[...]
    ).astype(o_ref.dtype)


def _round_up(n, m):
    return ((n + m - 1) // m) * m


def _device_profile():
    """Per-chip tuning: (tile_budget_bytes, vmem_limit_bytes, bf16_valu, multi_tc)."""
    vmem_cap = None
    try:
        vmem_cap = getattr(pltpu.get_tpu_info(), "vmem_capacity_bytes", None)
    except Exception:
        vmem_cap = None

    kind = ""
    try:
        kind = jax.devices()[0].device_kind.lower()
    except Exception:
        kind = ""

    bf16_valu = ("v6" in kind) or ("v7" in kind)   # v5e has no bf16 VALU
    multi_tc = "v7" in kind                        # 2 TensorCores per chip

    if vmem_cap is not None and vmem_cap <= (64 << 20):
        # v7x-class: 64 MiB VMEM/TC -> small tiles, default 32 MiB scoped limit.
        return (3 << 20), (32 << 20), bf16_valu, True
    if vmem_cap is None:
        # Unknown hardware: conservative defaults that fit every generation.
        return (4 << 20), (32 << 20), bf16_valu, multi_tc
    # v5e / v6e: 128 MiB VMEM -> larger streaming tiles, raised scoped limit.
    return (6 << 20), (48 << 20), bf16_valu, multi_tc


def _choose_block_rows(n_rows, d_model, itemsize, tile_budget_bytes, split_even):
    """Largest bytes-budgeted row tile, multiple of 8 sublanes; optionally nudged
    so the 1-D grid has an even (>= 2) number of steps (v7x megacore)."""
    bytes_per_row = max(d_model * itemsize, 1)
    rows = int(tile_budget_bytes // bytes_per_row)
    rows = max(8, (rows // 8) * 8)                 # sublane multiple, bytes-based (no row cap)
    rows = min(rows, _round_up(n_rows, 8))         # never bigger than the (rounded) input

    if split_even and n_rows > 8:
        steps = -(-n_rows // rows)                 # cdiv
        if steps % 2 == 1:
            target = steps + 1 if steps > 1 else 2
            cand = _round_up(-(-n_rows // target), 8)
            if cand >= 8:
                rows = max(8, min(cand, rows))
    return max(rows, 8)


def rmsnorm(x, alpha, eps=1e-9, *, block_rows=None):
    """RMSNorm over the last axis of x, scaled by alpha (shape (d_model,))."""
    orig_shape = x.shape
    d_model = orig_shape[-1]
    assert alpha.shape == (d_model,)

    x2d = x.reshape(-1, d_model)
    n_rows = x2d.shape[0]

    tile_budget, vmem_limit, bf16_valu, multi_tc = _device_profile()

    if block_rows is None:
        block_rows = _choose_block_rows(
            n_rows, d_model, jnp.dtype(x.dtype).itemsize, tile_budget, multi_tc
        )

    grid = (pl.cdiv(n_rows, block_rows),)          # partial last block handled by Pallas

    # Scale path dtype: bf16 only when the input is bf16 and the chip has a
    # bf16 VALU (v6e/v7x).  f32 everywhere else (bit-tight for f32 callers).
    if x.dtype == jnp.bfloat16 and bf16_valu:
        scale_dtype = jnp.bfloat16
    else:
        scale_dtype = jnp.float32
    alpha_blk = alpha.astype(scale_dtype).reshape(1, d_model)

    # Approximate (EUP) reciprocal only when output precision can't see it.
    approx_recip = x.dtype != jnp.float32

    out = pl.pallas_call(
        functools.partial(_rmsnorm_kernel, eps=eps, approx_recip=approx_recip),
        out_shape=jax.ShapeDtypeStruct((n_rows, d_model), x.dtype),
        grid=grid,
        in_specs=[
            pl.BlockSpec((block_rows, d_model), lambda i: (i, 0)),
            pl.BlockSpec((1, d_model), lambda i: (0, 0)),
        ],
        out_specs=pl.BlockSpec((block_rows, d_model), lambda i: (i, 0)),
        compiler_params=pltpu.CompilerParams(
            dimension_semantics=("parallel",),     # rows shard across TCs on v7x megacore
            vmem_limit_bytes=vmem_limit,
        ),
    )(x2d, alpha_blk)

    return out.reshape(orig_shape)


if __name__ == "__main__":
    # Module init: d_model hidden size, alpha = ones(d_model) (deterministic).
    batch, seq, d_model = 2, 8, 32
    eps = 1e-9

    key = jax.random.PRNGKey(0)
    x = jax.random.normal(key, (batch, seq, d_model), dtype=jnp.float32)
    alpha = jnp.ones((d_model,), dtype=jnp.float32)

    out = rmsnorm(x, alpha, eps)
    out = jax.block_until_ready(out)

    # Reference check in plain JAX (mirrors the PyTorch forward exactly).
    ref = alpha * x / (jnp.sqrt(jnp.mean(x * x, axis=-1, keepdims=True)) + eps)
    assert out.shape == x.shape and out.dtype == x.dtype
    assert jnp.allclose(out, ref, atol=1e-5, rtol=1e-5)

    print("KERNEL_OK")
</pallas_src>

<mosaic_0001>
module attributes {stable_mosaic.version = 11 : i64} {
  func.func @_rmsnorm_kernel(%arg0: i32, %arg1: memref<16x32xf32, #tpu.memory_space<vmem>>, %arg2: memref<1x32xf32, #tpu.memory_space<vmem>>, %arg3: memref<16x32xf32, #tpu.memory_space<vmem>>) attributes {dimension_semantics = [#tpu.dimension_semantics<parallel>], iteration_bounds = array<i64: 1>, scalar_prefetch = 0 : i64, scratch_operands = 0 : i64, tpu.core_type = #tpu.core_type<tc>, window_params = [{transform_indices = @transform_0, window_bounds = array<i64: 16, 32>}, {pipeline_mode = #tpu.pipeline_mode<synchronous>, transform_indices = @transform_1, window_bounds = array<i64: 1, 32>}, {transform_indices = @transform_2, window_bounds = array<i64: 16, 32>}]} {
    %c0 = arith.constant 0 : index
    %c0_0 = arith.constant 0 : index
    %0 = vector.load %arg1[%c0, %c0_0] : memref<16x32xf32, #tpu.memory_space<vmem>>, vector<16x32xf32>
    %1 = arith.mulf %0, %0 : vector<16x32xf32>
    %cst = arith.constant dense<0.000000e+00> : vector<16xf32>
    %2 = vector.multi_reduction <add>, %1, %cst [1] : vector<16x32xf32> to vector<16xf32>
    %3 = vector.shape_cast %2 : vector<16xf32> to vector<16x1xf32>
    %cst_1 = arith.constant 3.200000e+01 : f32
    %4 = vector.broadcast %cst_1 : f32 to vector<16x1xf32>
    %5 = arith.divf %3, %4 : vector<16x1xf32>
    %6 = math.sqrt %5 : vector<16x1xf32>
    %cst_2 = arith.constant 9.99999971E-10 : f32
    %7 = vector.broadcast %cst_2 : f32 to vector<16x1xf32>
    %8 = arith.addf %6, %7 : vector<16x1xf32>
    %9 = tpu.reciprocal %8 : vector<16x1xf32> -> vector<16x1xf32>
    %c0_3 = arith.constant 0 : index
    %c0_4 = arith.constant 0 : index
    %10 = vector.load %arg1[%c0_3, %c0_4] : memref<16x32xf32, #tpu.memory_space<vmem>>, vector<16x32xf32>
    %11 = vector.broadcast %9 : vector<16x1xf32> to vector<16x32xf32>
    %12 = arith.mulf %10, %11 : vector<16x32xf32>
    %c0_5 = arith.constant 0 : index
    %c0_6 = arith.constant 0 : index
    %13 = vector.load %arg2[%c0_5, %c0_6] : memref<1x32xf32, #tpu.memory_space<vmem>>, vector<1x32xf32>
    %14 = vector.broadcast %13 : vector<1x32xf32> to vector<16x32xf32>
    %15 = arith.mulf %12, %14 : vector<16x32xf32>
    %c0_7 = arith.constant 0 : index
    %c0_8 = arith.constant 0 : index
    %16 = vector.load %arg3[%c0_7, %c0_8] : memref<16x32xf32, #tpu.memory_space<vmem>>, vector<16x32xf32>
    tpu.vector_store %arg3[%c0_7, %c0_8], %15 {strides = array<i32>} : memref<16x32xf32, #tpu.memory_space<vmem>>, vector<16x32xf32>,
    return
  }
  func.func @transform_0(%arg0: i32) -> (i32, i32) {
    %c0_i32 = arith.constant 0 : i32
    %c0_i32_0 = arith.constant 0 : i32
    return %arg0, %c0_i32 : i32, i32
  }
  func.func @transform_1(%arg0: i32) -> (i32, i32) {
    %c0_i32 = arith.constant 0 : i32
    %c0_i32_0 = arith.constant 0 : i32
    %c0_i32_1 = arith.constant 0 : i32
    return %c0_i32, %c0_i32_0 : i32, i32
  }
  func.func @transform_2(%arg0: i32) -> (i32, i32) {
    %c0_i32 = arith.constant 0 : i32
    %c0_i32_0 = arith.constant 0 : i32
    return %arg0, %c0_i32 : i32, i32
  }
}

</mosaic_0001>

<bundles_post_ra>
// kernel: tpu_custom_call.1
= control target key start
LH: loop header
LB: loop body
LE: loop exit
PB: predicated region body
PF: predicated region fallthrough
CT: control target
= control target key end

     0   :  { %7 = vsyncpa [#allocation3], 0  ;;  %s205_s0 = inlined_call_operand.hbm [shape: f32[16,32], index: 0, kind: input, shape index: {}]   ;;  %s206_s1 = inlined_call_operand.vmem [shape: f32[1,32], index: 1, kind: input, shape index: {}]   ;;  %s207_s2 = inlined_call_operand.hbm [shape: f32[16,32], index: 2, kind: output, shape index: {}]  }
   0x1   :  { %8 = vsyncpa [#allocation4], 0  ;;  %s149_s9 = smov [#allocation2]   ;;  %s101_s13 = scalar_lea.hbm %s205_s0, 256 }
   0x2   :  { %s14_s10 = sshll.u32 %s149_s9, 4  ;;  %p102_p0 = scmp.ne.s32.totalorder %s205_s0, %s101_s13  ;;  %s15_s10 = int_to_ptr.vmem [resolvable:$true] %s14_s10 }
   0x3   :  { %p105_p1 = scmp.lt.u32.totalorder %s101_s13, %s205_s0 }
   0x5   :  { %p107_p2 = pnand %p105_p1, %p102_p0 }
   0x7   :  { %110 = shalt.err (!%p107_p2)
}
   0x8   :  { %s111_s18 = scalar_lea.vmem %s15_s10, 256  ;;  %p116_p4 = scmp.lt.s32.totalorder %s15_s10, %s15_s10 }
   0x9   :  { %p112_p3 = scmp.ne.s32.totalorder %s15_s10, %s111_s18  ;;  %p117_p5 = scmp.lt.s32.totalorder %s111_s18, %s111_s18 }
   0xb   :  { %p118_p6 = por %p117_p5, %p116_p4 }
   0xd   :  { %p119_p7 = pnand %p118_p6, %p112_p3 }
   0xf   :  { %122 = shalt.err (!%p119_p7)
}
  0x10   :  { %s150_s19 = smov 128   ;;  %s151_s20 = smov 8  }
  0x11   :  { %20 = dma.hbm_to_vmem [thread:$0]  %s205_s0, 256, %s15_s10, [#allocation3], %s150_s19, %s150_s19, %s151_s20  }
  0x12   :  { %145 = dma.done.wait [#allocation3], 256  }
  0x13   :  { %146 = vsyncadd [#allocation3], 4294967040  ;;  %v26_v0 = vld [vmem:[#allocation2] sm:$0xff]  ;;  %vm30_vm0 = vcmask 261120   ;;  %v27_v1 = vld [vmem:[#allocation2 + $0x8] sm:$0xff]  ;;  %s152_s24 = smov [#allocation5]  }
  0x14   :  { %v28_v2 = vmul.f32 %v26_v0, %v26_v0  ;;  %v29_v3 = vmul.f32 %v27_v1, %v27_v1  ;;  %v88_v23 = vld [vmem:[%s206_s1] ss:$0 sm:$0xff]  ;;  %s76_s25 = sshll.u32 %s152_s24, 4  ;;  %s77_s25 = int_to_ptr.vmem [resolvable:$true] %s76_s25 }
  0x15   :  { %s123_s26 = scalar_lea.vmem %s77_s25, 256  ;;  %p128_p9 = scmp.lt.s32.totalorder %s77_s25, %s77_s25 }
  0x16   :  { %v31_v4 = vsel %vm30_vm0, %v28_v2, 0.0  ;;  %v34_v5 = vsel %vm30_vm0, %v29_v3, 0.0  ;;  %p124_p8 = scmp.ne.s32.totalorder %s77_s25, %s123_s26  ;;  %p129_p10 = scmp.lt.s32.totalorder %s123_s26, %s123_s26 }
  0x17   :  { %32 = vadd.xlane.f32.xlu0 %v31_v4 }
  0x18   :  { %p130_p11 = por %p129_p10, %p128_p9 }
  0x1a   :  { %p131_p12 = pnand %p130_p11, %p124_p8 }
  0x1b   :  { %35 = vadd.xlane.f32.xlu0 %v34_v5 }
  0xa4   :  { %v33_v6 = vpop.xlane.xlu0 %32 }
  0xa5   :  { %v38_v7 = vmul.f32 0.03125, %v33_v6 }
  0xa7   :  { %93 = vrsqrt.f32 %v38_v7  ;;  %vm42_vm1 = vcmp.eq.f32.partialorder %v38_v7, inf  ;;  %v45_v12 = vand.u32 2147483648, %v38_v7  ;;  %vm44_vm2 = vcmp.eq.f32.partialorder %v38_v7, 0.0 }
  0xa8   :  { %v36_v8 = vpop.xlane.xlu0 %35 }
  0xa9   :  { %v39_v9 = vmul.f32 0.03125, %v36_v8 }
  0xab   :  { %95 = vrsqrt.f32 %v39_v9  ;;  %vm49_vm3 = vcmp.eq.f32.partialorder %v39_v9, inf  ;;  %v52_v18 = vand.u32 2147483648, %v39_v9  ;;  %vm51_vm4 = vcmp.eq.f32.partialorder %v39_v9, 0.0 }
  0xb1   :  { %v94_v10 = vpop.eup %93 }
  0xb2   :  { %v41_v11 = vmul.f32 %v94_v10, %v38_v7 }
  0xb4   :  { %v43_v13 = vsel %vm42_vm1, %v38_v7, %v41_v11 }
  0xb5   :  { %v96_v14 = vpop.eup %95  ;;  %v46_v15 = vsel %vm44_vm2, %v45_v12, %v43_v13 }
  0xb6   :  { %v54_v16 = vadd.f32 1e-09, %v46_v15  ;;  %v48_v17 = vmul.f32 %v96_v14, %v39_v9 }
  0xb8   :  { %v50_v19 = vsel %vm49_vm3, %v39_v9, %v48_v17  ;;  %97 = vrcp.f32 %v54_v16 }
  0xb9   :  { %v53_v20 = vsel %vm51_vm4, %v52_v18, %v50_v19 }
  0xba   :  { %v55_v21 = vadd.f32 1e-09, %v53_v20 }
  0xbc   :  { %99 = vrcp.f32 %v55_v21 }
  0xc2   :  { %v98_v22 = vpop.eup %97 }
  0xc3   :  { %v58_v24 = vmul.f32 %v98_v22, %v26_v0 }
  0xc5   :  { %v67_v25 = vmul.f32 %v88_v23, %v58_v24 }
  0xc6   :  { %v100_v26 = vpop.eup %99 }
  0xc7   :  { %v59_v27 = vmul.f32 %v100_v26, %v27_v1  ;;  %69 = vst.msk [vmem:[#allocation5] sm:$0xff] %vm30_vm0, %v67_v25 }
  0xc9   :  { %v68_v28 = vmul.f32 %v88_v23, %v59_v27 }
  0xcb   :  { %70 = vst.msk [vmem:[#allocation5 + $0x8] sm:$0xff] %vm30_vm0, %v68_v28 }
  0xcc   :  { %134 = shalt.err (!%p131_p12)
}
  0xcd   :  { %s135_s28 = scalar_lea.hbm %s207_s2, 256 }
  0xce   :  { %p136_p13 = scmp.ne.s32.totalorder %s207_s2, %s135_s28  ;;  %p139_p0 = scmp.lt.u32.totalorder %s135_s28, %s207_s2 }
  0xd0   :  { %p141_p1 = pnand %p139_p0, %p136_p13 }
  0xd2   :  { %144 = shalt.err (!%p141_p1)
}
  0xd3   :  { %82 = dma.vmem_to_hbm [thread:$0]  %s77_s25, 256, %s207_s2, [#allocation4], %s150_s19, %s150_s19, %s151_s20  }
  0xd4   :  { %147 = dma.done.wait [#allocation4], 256  }
  0xd5   :  { %148 = vsyncadd [#allocation4], 4294967040 }
  0xd6   :  { %86 = vsyncpa [#allocation3], 1 }
  0xd7   :  { %87 = vsyncpa [#allocation4], 1 }

</bundles_post_ra>
